<compile_context>
chip_gen: v7x
topology: tpu7x:2x2x1
jax: 0.10.0
libtpu: 0.0.40
codegen_flags: <defaults>
</compile_context>

<pallas_src>
import functools

import jax
import jax.numpy as jnp
from jax.experimental import pallas as pl
from jax.experimental.pallas import tpu as pltpu

LANE = 128
SUB_ROWS = 64   # (64,128) f32 sub-chunk = 8 vregs per operand; stays in vregs


def _chip_config():
    """(num_partials, max_tile_rows, vmem_limit_bytes) per TPU generation."""
    try:
        kind = jax.devices()[0].device_kind.lower()
    except Exception:  # pragma: no cover - defensive
        kind = ""
    if "v7" in kind:
        # 2 TensorCores, only 64 MiB physical VMEM -> 2 MiB tiles.
        return 2, 4096, 32 << 20
    if "v6" in kind:
        # Single TC, 128 MiB VMEM, 1.4 TB/s HBM -> big 4 MiB tiles.
        return 1, 8192, 64 << 20
    # v5e / unknown: single TC, conservative tiles.
    return 1, 4096, 32 << 20


def _focal_loss_kernel(gamma, valid_rows, tile_rows, sub_rows, tiles_per_core,
                       needs_mask, hard_targets, x_ref, t_ref, o_ref):
    c = pl.program_id(0)      # partial (core) index
    j = pl.program_id(1)      # tile index within this partial

    @pl.when(j == 0)
    def _():
        o_ref[...] = jnp.zeros_like(o_ref)

    n_sub = tile_rows // sub_rows
    # Unclamped tile index: the index_map clamps OOB tiles to the last block,
    # but masking must use the true index so duplicates contribute zero.
    tile_idx = c * tiles_per_core + j

    if needs_mask:
        # Per-tile count of valid rows (0 for fully-masked duplicate tiles).
        # int32 is fine: valid_rows = numel/128 << 2^31 for realistic inputs.
        rows_in_tile = jnp.clip(valid_rows - tile_idx * tile_rows, 0, tile_rows)
        # Hoisted local row-index iota (sub_rows, LANE).
        row_iota = jax.lax.broadcasted_iota(jnp.int32, (sub_rows, LANE), 0)

    def chunk(i, acc):
        r0 = pl.multiple_of(i * sub_rows, sub_rows)
        x = x_ref[pl.ds(r0, sub_rows), :].astype(jnp.float32)
        t = t_ref[pl.ds(r0, sub_rows), :].astype(jnp.float32)

        # Stable BCE-with-logits, identical to the PyTorch expression:
        #   max(x,0) - x*t + log1p(exp(-|x|))
        e_x = jnp.exp(-jnp.abs(x))
        bce = jnp.maximum(x, 0.0) - x * t + jnp.log1p(e_x)

        # Focal factor = exp(gamma * logsigmoid(z)), z = -x * (2t - 1).
        z = -x * (t * 2.0 - 1.0)
        if hard_targets:
            e_z = e_x            # |z| == |x| exactly when t in {0, 1}
        else:
            e_z = jnp.exp(-jnp.abs(z))
        if gamma == 2.0:
            sig = jnp.where(z >= 0.0, 1.0, e_z) / (1.0 + e_z)
            factor = sig * sig
        elif gamma == 1.0:
            factor = jnp.where(z >= 0.0, 1.0, e_z) / (1.0 + e_z)
        else:
            # logsigmoid(z) = min(z, 0) - log1p(exp(-|z|))
            factor = jnp.exp(gamma * (jnp.minimum(z, 0.0) - jnp.log1p(e_z)))

        loss = factor * bce

        if needs_mask:
            gidx = row_iota + r0
            # Select (not multiply): garbage rows may hold NaN/Inf.
            loss = jnp.where(gidx < rows_in_tile, loss, 0.0)

        # (sub_rows,128) -> (8,128): pure sublane-group adds, no XLU.
        return acc + jnp.sum(loss.reshape(sub_rows // 8, 8, LANE), axis=0)

    acc0 = jnp.zeros((8, LANE), jnp.float32)
    acc = jax.lax.fori_loop(0, n_sub, chunk, acc0, unroll=min(n_sub, 4))
    o_ref[...] += acc


def _focal_terms(x, t, gamma):
    """Plain-jnp elementwise focal loss (used for the <128-element tail)."""
    x = x.astype(jnp.float32)
    t = t.astype(jnp.float32)
    bce = jnp.maximum(x, 0.0) - x * t + jnp.log1p(jnp.exp(-jnp.abs(x)))
    invprobs = jax.nn.log_sigmoid(-x * (t * 2.0 - 1.0))
    return jnp.exp(invprobs * gamma) * bce


def focal_loss(logit, target, gamma=2.0, hard_targets=False):
    """Pallas implementation of FocalLoss(gamma).forward(logit, target).

    hard_targets=True enables an exact exp-dedup valid only for t in {0, 1}.
    """
    orig_shape = logit.shape
    n = logit.size

    # Divisor semantics of the PyTorch module:
    #   2-D input  -> loss.sum(dim=1).mean() == total_sum / N_rows
    #   otherwise  -> loss.mean()            == total_sum / numel
    divisor = float(orig_shape[0]) if len(orig_shape) == 2 else float(n)

    x = jnp.ravel(logit)
    t = jnp.ravel(target)

    n_main = (n // LANE) * LANE
    rem = n - n_main

    total = jnp.float32(0.0)
    if rem:
        # <128-element remainder: cheaper in plain jnp than padding the
        # whole tensor (which would double HBM traffic).
        total = total + jnp.sum(_focal_terms(x[n_main:], t[n_main:], gamma))

    if n_main:
        num_partials, max_tile_rows, vmem_limit = _chip_config()
        rows = n_main // LANE                       # valid rows
        xm = (x[:n_main] if rem else x).reshape(rows, LANE)
        tm = (t[:n_main] if rem else t).reshape(rows, LANE)

        if rows < SUB_ROWS:
            # Tiny input: pad to one sub-chunk (<32 KiB, negligible); padded
            # rows are excluded by the in-kernel row mask.
            pad_r = SUB_ROWS - rows
            xm = jnp.pad(xm, ((0, pad_r), (0, 0)))
            tm = jnp.pad(tm, ((0, pad_r), (0, 0)))
            rows_p = SUB_ROWS
        else:
            rows_p = rows

        # tile_rows: multiple of SUB_ROWS, never exceeding the array rows.
        tile_rows = min(max_tile_rows, (rows_p // SUB_ROWS) * SUB_ROWS)
        n_tiles = pl.cdiv(rows_p, tile_rows)
        if n_tiles < num_partials:
            num_partials = 1                        # avoid duplicated tiles
        tiles_per_core = pl.cdiv(n_tiles, num_partials)
        covered_rows = num_partials * tiles_per_core * tile_rows
        needs_mask = covered_rows != rows

        def in_map(c, j):
            # Clamp out-of-range tile indices (fully-masked tiles) to the
            # last block.
            return (jnp.minimum(c * tiles_per_core + j, n_tiles - 1), 0)

        in_spec = pl.BlockSpec((tile_rows, LANE), in_map)
        out_spec = pl.BlockSpec((8, LANE), lambda c, j: (c, 0))

        partials = pl.pallas_call(
            functools.partial(
                _focal_loss_kernel, float(gamma), int(rows), int(tile_rows),
                int(SUB_ROWS), int(tiles_per_core), bool(needs_mask),
                bool(hard_targets)),
            out_shape=jax.ShapeDtypeStruct((num_partials * 8, LANE),
                                           jnp.float32),
            grid_spec=pltpu.PrefetchScalarGridSpec(
                num_scalar_prefetch=0,
                grid=(num_partials, tiles_per_core),
                in_specs=[in_spec, in_spec],
                out_specs=out_spec,
            ),
            compiler_params=pltpu.CompilerParams(
                dimension_semantics=("parallel", "arbitrary"),
                vmem_limit_bytes=vmem_limit,
            ),
        )(xm, tm)
        total = total + jnp.sum(partials)

    return total / divisor


def _focal_loss_ref(logit, target, gamma=2.0):
    """Pure-JAX reference mirroring the PyTorch forward."""
    x = logit.astype(jnp.float32)
    t = target.astype(jnp.float32)
    max_val = jnp.maximum(-x, 0.0)
    loss = x - x * t + max_val + jnp.log(jnp.exp(-max_val) + jnp.exp(-x - max_val))
    invprobs = jax.nn.log_sigmoid(-x * (t * 2.0 - 1.0))
    loss = jnp.exp(invprobs * gamma) * loss
    if loss.ndim == 2:
        loss = loss.sum(axis=1)
    return loss.mean()


if __name__ == "__main__":
    key = jax.random.PRNGKey(0)
    k1, k2 = jax.random.split(key)

    # Segmentation-style logits/targets: NCHW, small shape (single padded tile,
    # in-kernel row mask; hard_targets exp-dedup path).
    B, C, H, W = 2, 4, 16, 16
    logit = jax.random.normal(k1, (B, C, H, W), dtype=jnp.float32) * 2.0
    target = (jax.random.uniform(k2, (B, C, H, W)) > 0.5).astype(jnp.float32)
    out = jax.block_until_ready(focal_loss(logit, target, gamma=2.0,
                                           hard_targets=True))
    ref = _focal_loss_ref(logit, target, gamma=2.0)
    assert jnp.allclose(out, ref, rtol=1e-5, atol=1e-5), (out, ref)

    # 2-D branch (sum over dim=1 then mean); generic (non hard-target) path.
    logit2d = jax.random.normal(k1, (8, 32), dtype=jnp.float32)
    target2d = (jax.random.uniform(k2, (8, 32)) > 0.5).astype(jnp.float32)
    out2d = jax.block_until_ready(focal_loss(logit2d, target2d, gamma=2.0))
    ref2d = _focal_loss_ref(logit2d, target2d, gamma=2.0)
    assert jnp.allclose(out2d, ref2d, rtol=1e-5, atol=1e-5), (out2d, ref2d)

    # Aligned multi-sub-chunk case: exercises the unmasked inner fori_loop.
    logit3 = jax.random.normal(k1, (2, 3, 64, 64), dtype=jnp.float32)
    target3 = (jax.random.uniform(k2, (2, 3, 64, 64)) > 0.5).astype(jnp.float32)
    out3 = jax.block_until_ready(focal_loss(logit3, target3, gamma=2.0,
                                            hard_targets=True))
    ref3 = _focal_loss_ref(logit3, target3, gamma=2.0)
    assert jnp.allclose(out3, ref3, rtol=1e-5, atol=1e-5), (out3, ref3)

    # Ragged size: wrapper-side <128-element tail + in-kernel row mask.
    logit4 = jax.random.normal(k1, (5, 13, 7), dtype=jnp.float32)
    target4 = (jax.random.uniform(k2, (5, 13, 7)) > 0.5).astype(jnp.float32)
    out4 = jax.block_until_ready(focal_loss(logit4, target4, gamma=2.0))
    ref4 = _focal_loss_ref(logit4, target4, gamma=2.0)
    assert jnp.allclose(out4, ref4, rtol=1e-5, atol=1e-5), (out4, ref4)

    print("KERNEL_OK")
</pallas_src>

<mosaic_0001>
module attributes {stable_mosaic.version = 11 : i64} {
  func.func @_focal_loss_kernel(%arg0: i32, %arg1: i32, %arg2: memref<64x128xf32, #tpu.memory_space<vmem>>, %arg3: memref<64x128xf32, #tpu.memory_space<vmem>>, %arg4: memref<8x128xf32, #tpu.memory_space<vmem>>) attributes {dimension_semantics = [#tpu.dimension_semantics<parallel>, #tpu.dimension_semantics<arbitrary>], iteration_bounds = array<i64: 1, 1>, scalar_prefetch = 0 : i64, scratch_operands = 0 : i64, tpu.core_type = #tpu.core_type<tc>, window_params = [{transform_indices = @transform_0, window_bounds = array<i64: 64, 128>}, {transform_indices = @transform_1, window_bounds = array<i64: 64, 128>}, {transform_indices = @transform_2, window_bounds = array<i64: 8, 128>}]} {
    %c0_i32 = arith.constant 0 : i32
    %0 = arith.cmpi eq, %arg1, %c0_i32 : i32
    %1 = arith.extui %0 : i1 to i32
    %c0_i32_0 = arith.constant 0 : i32
    %2 = arith.cmpi ne, %1, %c0_i32_0 : i32
    scf.if %2 {
      %cst_21 = arith.constant 0.000000e+00 : f32
      %55 = vector.broadcast %cst_21 : f32 to vector<8x128xf32>
      %c0_22 = arith.constant 0 : index
      %c0_23 = arith.constant 0 : index
      %56 = vector.load %arg4[%c0_22, %c0_23] : memref<8x128xf32, #tpu.memory_space<vmem>>, vector<8x128xf32>
      tpu.vector_store %arg4[%c0_22, %c0_23], %55 {strides = array<i32>} : memref<8x128xf32, #tpu.memory_space<vmem>>, vector<8x128xf32>,
    } else {
    }
    %c1_i32 = arith.constant 1 : i32
    %3 = arith.muli %arg0, %c1_i32 : i32
    %4 = arith.addi %3, %arg1 : i32
    %c64_i32 = arith.constant 64 : i32
    %5 = arith.muli %4, %c64_i32 : i32
    %c16_i32 = arith.constant 16 : i32
    %6 = arith.subi %c16_i32, %5 : i32
    %c0_i32_1 = arith.constant 0 : i32
    %c64_i32_2 = arith.constant 64 : i32
    %7 = arith.maxsi %c0_i32_1, %6 : i32
    %8 = arith.minsi %c64_i32_2, %7 : i32
    %9 = tpu.iota {dimensions = array<i32: 0>} : vector<64x128xi32>
    %cst = arith.constant 0.000000e+00 : f32
    %10 = vector.broadcast %cst : f32 to vector<8x128xf32>
    %c0_i32_3 = arith.constant 0 : i32
    %c64_i32_4 = arith.constant 64 : i32
    %11 = arith.muli %c0_i32_3, %c64_i32_4 : i32
    %12 = tpu.assume_multiple %11, 64 : i32
    %13 = arith.index_cast %12 : i32 to index
    %c0 = arith.constant 0 : index
    %14 = vector.load %arg2[%13, %c0] : memref<64x128xf32, #tpu.memory_space<vmem>>, vector<64x128xf32>
    %15 = arith.index_cast %12 : i32 to index
    %c0_5 = arith.constant 0 : index
    %16 = vector.load %arg3[%15, %c0_5] : memref<64x128xf32, #tpu.memory_space<vmem>>, vector<64x128xf32>
    %17 = math.absf %14 : vector<64x128xf32>
    %cst_6 = arith.constant 0.000000e+00 : f32
    %18 = vector.broadcast %cst_6 : f32 to vector<64x128xf32>
    %19 = arith.subf %18, %17 : vector<64x128xf32>
    %20 = math.exp %19 : vector<64x128xf32>
    %cst_7 = arith.constant 0.000000e+00 : f32
    %21 = vector.broadcast %cst_7 : f32 to vector<64x128xf32>
    %22 = arith.maximumf %14, %21 : vector<64x128xf32>
    %23 = arith.mulf %14, %16 : vector<64x128xf32>
    %24 = arith.subf %22, %23 : vector<64x128xf32>
    %25 = math.log1p %20 : vector<64x128xf32>
    %26 = arith.addf %24, %25 : vector<64x128xf32>
    %cst_8 = arith.constant 0.000000e+00 : f32
    %27 = vector.broadcast %cst_8 : f32 to vector<64x128xf32>
    %28 = arith.subf %27, %14 : vector<64x128xf32>
    %cst_9 = arith.constant 2.000000e+00 : f32
    %29 = vector.broadcast %cst_9 : f32 to vector<64x128xf32>
    %30 = arith.mulf %16, %29 : vector<64x128xf32>
    %cst_10 = arith.constant 1.000000e+00 : f32
    %31 = vector.broadcast %cst_10 : f32 to vector<64x128xf32>
    %32 = arith.subf %30, %31 : vector<64x128xf32>
    %33 = arith.mulf %28, %32 : vector<64x128xf32>
    %cst_11 = arith.constant 0.000000e+00 : f32
    %34 = vector.broadcast %cst_11 : f32 to vector<64x128xf32>
    %35 = arith.cmpf oge, %33, %34 : vector<64x128xf32>
    %cst_12 = arith.constant 1.000000e+00 : f32
    %36 = vector.broadcast %cst_12 : f32 to vector<64x128xf32>
    %37 = arith.select %35, %36, %20 : vector<64x128xi1>, vector<64x128xf32>
    %cst_13 = arith.constant 1.000000e+00 : f32
    %38 = vector.broadcast %cst_13 : f32 to vector<64x128xf32>
    %39 = arith.addf %38, %20 : vector<64x128xf32>
    %40 = arith.divf %37, %39 : vector<64x128xf32>
    %41 = arith.mulf %40, %40 : vector<64x128xf32>
    %42 = arith.mulf %41, %26 : vector<64x128xf32>
    %43 = vector.broadcast %12 : i32 to vector<64x128xi32>
    %44 = arith.addi %9, %43 : vector<64x128xi32>
    %45 = vector.broadcast %8 : i32 to vector<64x128xi32>
    %46 = arith.cmpi slt, %44, %45 : vector<64x128xi32>
    %cst_14 = arith.constant 0.000000e+00 : f32
    %47 = vector.broadcast %cst_14 : f32 to vector<64x128xf32>
    %48 = arith.select %46, %42, %47 : vector<64x128xi1>, vector<64x128xf32>
    %49 = vector.shape_cast %48 : vector<64x128xf32> to vector<8x8x128xf32>
    %cst_15 = arith.constant dense<0.000000e+00> : vector<8x128xf32>
    %50 = vector.multi_reduction <add>, %49, %cst_15 [0] : vector<8x8x128xf32> to vector<8x128xf32>
    %51 = arith.addf %10, %50 : vector<8x128xf32>
    %c1_i32_16 = arith.constant 1 : i32
    %c0_17 = arith.constant 0 : index
    %c0_18 = arith.constant 0 : index
    %52 = vector.load %arg4[%c0_17, %c0_18] : memref<8x128xf32, #tpu.memory_space<vmem>>, vector<8x128xf32>
    %53 = arith.addf %52, %51 : vector<8x128xf32>
    %c0_19 = arith.constant 0 : index
    %c0_20 = arith.constant 0 : index
    %54 = vector.load %arg4[%c0_19, %c0_20] : memref<8x128xf32, #tpu.memory_space<vmem>>, vector<8x128xf32>
    tpu.vector_store %arg4[%c0_19, %c0_20], %53 {strides = array<i32>} : memref<8x128xf32, #tpu.memory_space<vmem>>, vector<8x128xf32>,
    return
  }
  func.func @transform_0(%arg0: i32, %arg1: i32) -> (i32, i32) {
    %c1_i32 = arith.constant 1 : i32
    %0 = arith.muli %arg0, %c1_i32 : i32
    %1 = arith.addi %0, %arg1 : i32
    %c0_i32 = arith.constant 0 : i32
    %2 = arith.minsi %1, %c0_i32 : i32
    %c0_i32_0 = arith.constant 0 : i32
    %c0_i32_1 = arith.constant 0 : i32
    return %2, %c0_i32_0 : i32, i32
  }
  func.func @transform_1(%arg0: i32, %arg1: i32) -> (i32, i32) {
    %c1_i32 = arith.constant 1 : i32
    %0 = arith.muli %arg0, %c1_i32 : i32
    %1 = arith.addi %0, %arg1 : i32
    %c0_i32 = arith.constant 0 : i32
    %2 = arith.minsi %1, %c0_i32 : i32
    %c0_i32_0 = arith.constant 0 : i32
    %c0_i32_1 = arith.constant 0 : i32
    return %2, %c0_i32_0 : i32, i32
  }
  func.func @transform_2(%arg0: i32, %arg1: i32) -> (i32, i32) {
    %c0_i32 = arith.constant 0 : i32
    %c0_i32_0 = arith.constant 0 : i32
    return %arg0, %c0_i32 : i32, i32
  }
}

</mosaic_0001>

<bundles_post_ra>
// kernel: tpu_custom_call.1
= control target key start
LH: loop header
LB: loop body
LE: loop exit
PB: predicated region body
PF: predicated region fallthrough
CT: control target
= control target key end

     0   :  { %7 = vsyncpa [#allocation3], 0  ;;  %s532_s0 = inlined_call_operand.hbm [shape: f32[64,128], index: 0, kind: input, shape index: {}]   ;;  %s533_s1 = inlined_call_operand.hbm [shape: f32[64,128], index: 1, kind: input, shape index: {}]   ;;  %s534_s2 = inlined_call_operand.hbm [shape: f32[8,128], index: 2, kind: output, shape index: {}]  }
   0x1   :  { %8 = vsyncpa [#allocation6], 0 }
   0x2   :  { %9 = vsyncpa [#allocation4], 0  ;;  %s476_s9 = smov [#allocation2]   ;;  %s404_s13 = scalar_lea.hbm %s532_s0, 1024 }
   0x3   :  { %s21_s10 = sshll.u32 %s476_s9, 4  ;;  %p405_p0 = scmp.ne.s32.totalorder %s532_s0, %s404_s13  ;;  %s22_s10 = int_to_ptr.vmem [resolvable:$true] %s21_s10 }
   0x4   :  { %p408_p1 = scmp.lt.u32.totalorder %s404_s13, %s532_s0 }
   0x6   :  { %p410_p2 = pnand %p408_p1, %p405_p0 }
   0x8   :  { %413 = shalt.err (!%p410_p2)
}
   0x9   :  { %s414_s18 = scalar_lea.vmem %s22_s10, 1024  ;;  %p419_p4 = scmp.lt.s32.totalorder %s22_s10, %s22_s10 }
   0xa   :  { %p415_p3 = scmp.ne.s32.totalorder %s22_s10, %s414_s18  ;;  %p420_p5 = scmp.lt.s32.totalorder %s414_s18, %s414_s18 }
   0xc   :  { %p421_p6 = por %p420_p5, %p419_p4 }
   0xe   :  { %p422_p7 = pnand %p421_p6, %p415_p3 }
  0x10   :  { %425 = shalt.err (!%p422_p7)
}
  0x11   :  { %s477_s19 = smov 128   ;;  %s478_s20 = smov 8  }
  0x12   :  { %27 = dma.hbm_to_vmem [thread:$0]  %s532_s0, 1024, %s22_s10, [#allocation3], %s477_s19, %s477_s19, %s478_s20  }
  0x13   :  { %s479_s23 = smov [#allocation5]   ;;  %s426_s27 = scalar_lea.hbm %s533_s1, 1024 }
  0x14   :  { %s39_s24 = sshll.u32 %s479_s23, 4  ;;  %p427_p8 = scmp.ne.s32.totalorder %s533_s1, %s426_s27  ;;  %s40_s24 = int_to_ptr.vmem [resolvable:$true] %s39_s24 }
  0x15   :  { %p430_p9 = scmp.lt.u32.totalorder %s426_s27, %s533_s1 }
  0x17   :  { %p432_p10 = pnand %p430_p9, %p427_p8 }
  0x19   :  { %435 = shalt.err (!%p432_p10)
}
  0x1a   :  { %s436_s4 = scalar_lea.vmem %s40_s24, 1024  ;;  %p441_p12 = scmp.lt.s32.totalorder %s40_s24, %s40_s24 }
  0x1b   :  { %p437_p11 = scmp.ne.s32.totalorder %s40_s24, %s436_s4  ;;  %p442_p13 = scmp.lt.s32.totalorder %s436_s4, %s436_s4 }
  0x1d   :  { %p443_p0 = por %p442_p13, %p441_p12 }
  0x1f   :  { %p444_p1 = pnand %p443_p0, %p437_p11 }
  0x21   :  { %447 = shalt.err (!%p444_p1)
}
  0x22   :  { %45 = dma.hbm_to_vmem [thread:$0]  %s533_s1, 1024, %s40_s24, [#allocation6], %s477_s19, %s477_s19, %s478_s20  }
  0x23   :  { %470 = dma.done.wait [#allocation3], 1024  }
  0x24   :  { %471 = vsyncadd [#allocation3], 4294966272 }
  0x25   :  { %472 = dma.done.wait [#allocation6], 1024  }
  0x26   :  { %473 = vsyncadd [#allocation6], 4294966272  ;;  %v81_v0 = vld [vmem:[#allocation2] sm:$0xff]  ;;  %v82_v1 = vld [vmem:[#allocation2 + $0x8] sm:$0xff]  ;;  %s480_s1 = smov [#allocation7]  }
  0x27   :  { %v97_v2 = vand.u32 2147483647, %v81_v0  ;;  %v98_v3 = vand.u32 2147483647, %v82_v1  ;;  %v89_v8 = vld [vmem:[#allocation5] sm:$0xff]  ;;  %v90_v9 = vld [vmem:[#allocation5 + $0x8] sm:$0xff] }
  0x28   :  { %v241_v10 = vmul.f32 2.0, %v89_v8  ;;  %v242_v11 = vmul.f32 2.0, %v90_v9  ;;  %v233_v16 = vsub.f32 0.0, %v81_v0  ;;  %v234_v18 = vsub.f32 0.0, %v82_v1  ;;  %s364_s6 = sshll.u32 %s480_s1, 4  ;;  %s365_s6 = int_to_ptr.vmem [resolvable:$true] %s364_s6 }
  0x29   :  { %v105_v4 = vsub.f32 0.0, %v97_v2  ;;  %v106_v5 = vsub.f32 0.0, %v98_v3  ;;  %v129_v25 = vmax.f32 %v81_v0, 0.0  ;;  %v137_v26 = vmul.f32 %v89_v8, %v81_v0  ;;  %s448_s7 = scalar_lea.vmem %s365_s6, 128  ;;  %p453_p3 = scmp.lt.s32.totalorder %s365_s6, %s365_s6 }
  0x2a   :  { %v378_v17 = vadd.f32 -1.0, %v241_v10  ;;  %v379_v19 = vadd.f32 -1.0, %v242_v11  ;;  %v130_v29 = vmax.f32 %v82_v1, 0.0  ;;  %v138_v30 = vmul.f32 %v90_v9, %v82_v1  ;;  %p449_p2 = scmp.ne.s32.totalorder %s365_s6, %s448_s7  ;;  %p454_p4 = scmp.lt.s32.totalorder %s448_s7, %s448_s7 }
  0x2b   :  { %v113_v6 = vmul.f32 1.442695, %v105_v4  ;;  %v115_v7 = vmul.f32 1.442695, %v106_v5  ;;  %v145_v34 = vsub.f32 %v129_v25, %v137_v26 }
  0x2c   :  { %v257_v22 = vmul.f32 %v378_v17, %v233_v16  ;;  %v258_v23 = vmul.f32 %v379_v19, %v234_v18  ;;  %v146_v38 = vsub.f32 %v130_v29, %v138_v30  ;;  %p455_p5 = por %p454_p4, %p453_p3 }
  0x2d   :  { %392 = vpow2.f32 %v113_v6 }
  0x2e   :  { %394 = vpow2.f32 %v115_v7  ;;  %vm265_vm0 = vcmp.ge.f32.partialorder %v257_v22, 0.0  ;;  %vm266_vm1 = vcmp.ge.f32.partialorder %v258_v23, 0.0  ;;  %p456_p6 = pnand %p455_p5, %p449_p2 }
  0x37   :  { %v393_v12 = vpop.eup %392 }
  0x38   :  { %v395_v13 = vpop.eup %394  ;;  %v153_v14 = vadd.f32 1.0, %v393_v12  ;;  %v156_v20 = vmul.f32 -0.5, %v393_v12  ;;  %v159_v27 = vand.u32 2147483647, %v393_v12  ;;  %v273_v36 = vsel %vm265_vm0, 1.0, %v393_v12 }
  0x39   :  { %v162_v15 = vadd.f32 1.0, %v395_v13  ;;  %v165_v21 = vmul.f32 -0.5, %v395_v13  ;;  %v168_v31 = vand.u32 2147483647, %v395_v13  ;;  %v274_v40 = vsel %vm266_vm1, 1.0, %v395_v13 }
  0x3a   :  { %396 = vlog2.f32 %v153_v14  ;;  %v157_v24 = vadd.f32 1.0, %v156_v20  ;;  %vm160_vm2 = vcmp.lt.f32.partialorder %v159_v27, 0.0004427343 }
  0x3b   :  { %398 = vlog2.f32 %v162_v15  ;;  %v166_v28 = vadd.f32 1.0, %v165_v21  ;;  %vm169_vm3 = vcmp.lt.f32.partialorder %v168_v31, 0.0004427343 }
  0x3c   :  { %400 = vrcp.f32 %v153_v14  ;;  %v158_v32 = vmul.f32 %v393_v12, %v157_v24 }
  0x3d   :  { %402 = vrcp.f32 %v162_v15  ;;  %v167_v35 = vmul.f32 %v395_v13, %v166_v28 }
  0x44   :  { %v397_v33 = vpop.eup %396 }
  0x45   :  { %v399_v37 = vpop.eup %398  ;;  %v155_v39 = vmul.f32 0.6931472, %v397_v33 }
  0x46   :  { %v401_v41 = vpop.eup %400  ;;  %v164_v42 = vmul.f32 0.6931472, %v399_v37 }
  0x47   :  { %v403_v43 = vpop.eup %402  ;;  %v161_v44 = vsel %vm160_vm2, %v158_v32, %v155_v39  ;;  %v290_v45 = vmul.f32 %v401_v41, %v273_v36 }
  0x48   :  { %v170_v46 = vsel %vm169_vm3, %v167_v35, %v164_v42  ;;  %v225_v47 = vadd.f32 %v161_v44, %v145_v34  ;;  %v292_v48 = vmul.f32 %v403_v43, %v274_v40 }
  0x49   :  { %v226_v49 = vadd.f32 %v170_v46, %v146_v38  ;;  %v305_v50 = vmul.f32 %v290_v45, %v290_v45 }
  0x4a   :  { %v306_v51 = vmul.f32 %v292_v48, %v292_v48 }
  0x4b   :  { %v313_v52 = vmul.f32 %v305_v50, %v225_v47 }
  0x4c   :  { %v314_v53 = vmul.f32 %v306_v51, %v226_v49 }
  0x4e   :  { %v347_v54 = vadd.f32 %v314_v53, %v313_v52 }
  0x50   :  { %357 = vst [vmem:[#allocation7] sm:$0xff] %v347_v54 }
  0x51   :  { %459 = shalt.err (!%p456_p6)
}
  0x52   :  { %s460_s10 = scalar_lea.hbm %s534_s2, 128 }
  0x53   :  { %p461_p7 = scmp.ne.s32.totalorder %s534_s2, %s460_s10  ;;  %p464_p8 = scmp.lt.u32.totalorder %s460_s10, %s534_s2 }
  0x55   :  { %p466_p9 = pnand %p464_p8, %p461_p7 }
  0x57   :  { %469 = shalt.err (!%p466_p9)
}
  0x58   :  { %367 = dma.vmem_to_hbm [thread:$0]  %s365_s6, 128, %s534_s2, [#allocation4]  }
  0x59   :  { %474 = dma.done.wait [#allocation4], 128  }
  0x5a   :  { %475 = vsyncadd [#allocation4], 4294967168 }
  0x5b   :  { %371 = vsyncpa [#allocation3], 1 }
  0x5c   :  { %372 = vsyncpa [#allocation6], 1 }
  0x5d   :  { %373 = vsyncpa [#allocation4], 1 }

</bundles_post_ra>
